<compile_context>
chip_gen: v7x
topology: tpu7x:2x2x1
jax: 0.10.0
libtpu: 0.0.40
codegen_flags: <defaults>
</compile_context>

<pallas_src>
import functools

import jax
import jax.numpy as jnp
from jax.experimental import pallas as pl
from jax.experimental.pallas import tpu as pltpu


def _round_up(n, m):
    return ((n + m - 1) // m) * m


# --------------------------------------------------------------------------------------
# Fused kernel: x -> (Linear(+folded BN) + LeakyReLU) * (L-1) -> Linear
# refs layout: x_ref, w0, b0, w1, b1, ..., w_{L-1}, b_{L-1}, o_ref
# --------------------------------------------------------------------------------------
def _fused_decoder_kernel(*refs, num_layers, leaky_slope):
    x_ref = refs[0]
    o_ref = refs[-1]
    layer_refs = refs[1:-1]

    h = x_ref[...]  # (TILE_B, D_in) f32 activations; intermediates never leave VMEM.
    for li in range(num_layers):
        w_ref = layer_refs[2 * li]
        b_ref = layer_refs[2 * li + 1]
        # bf16 operands into the MXU (cast immediately before the dot), f32 accumulation.
        y = jnp.dot(h.astype(w_ref.dtype), w_ref[...],
                    preferred_element_type=jnp.float32)
        y = y + b_ref[...]
        if li < num_layers - 1:          # hidden layers: BN folded, LeakyReLU on the VPU in f32
            y = jnp.where(y >= 0.0, y, leaky_slope * y)
        h = y
    o_ref[...] = h.astype(o_ref.dtype)


# --------------------------------------------------------------------------------------
# Parameter construction: mirrors the PyTorch layer shapes, folds BN (eval mode),
# pads *output* feature dims to 128 lanes.  The very first input dim keeps its real size
# so x needs no host-side feature padding.
# --------------------------------------------------------------------------------------
def build_decoder_params(key, latent_dim, hidden_dim, output_dim,
                         bn_eps=1e-5, param_dtype=jnp.bfloat16):
    dims = [latent_dim] + list(hidden_dim) + [output_dim]
    # Input dim of layer 0 is NOT padded; every other dim is padded to a multiple of 128.
    padded = [latent_dim] + [_round_up(d, 128) for d in dims[1:]]
    n_layers = len(dims) - 1
    keys = jax.random.split(key, n_layers * 5)

    weights, biases = [], []
    for li in range(n_layers):
        din, dout = dims[li], dims[li + 1]
        din_p, dout_p = padded[li], padded[li + 1]
        k_w, k_b, k_g, k_be, k_m = keys[li * 5: li * 5 + 5]

        w = jax.random.normal(k_w, (din, dout), jnp.float32) / jnp.sqrt(din)
        b = jax.random.normal(k_b, (dout,), jnp.float32) * 0.01

        is_output = (li == n_layers - 1)
        if not is_output:
            # BatchNorm1d (eval mode) affine, folded into the linear layer once, host-side.
            gamma = 1.0 + 0.1 * jax.random.normal(k_g, (dout,), jnp.float32)
            beta = 0.1 * jax.random.normal(k_be, (dout,), jnp.float32)
            r_mean = 0.1 * jax.random.normal(k_m, (dout,), jnp.float32)
            r_var = jnp.ones((dout,), jnp.float32)
            scale = gamma / jnp.sqrt(r_var + bn_eps)
            shift = beta - r_mean * scale
            w = w * scale[None, :]
            b = b * scale + shift

        # Zero-pad to lane-dense shapes.  Padded output lanes carry zeros and feed zero weight
        # rows of the next layer, so they never affect the real outputs.
        w_p = jnp.zeros((din_p, dout_p), jnp.float32).at[:din, :dout].set(w)
        b_p = jnp.zeros((1, dout_p), jnp.float32).at[0, :dout].set(b)

        weights.append(w_p.astype(param_dtype))  # bf16 into the MXU
        biases.append(b_p)                       # bias stays f32

    return weights, biases


def _choose_batch_tile(batch, tile_b):
    """Balanced batch tiling: big tiles, minimal padding, >=2 tiles once batch >= 16 (v7x TCs)."""
    if batch < 16:
        return _round_up(batch, 8)                       # single tile, no batch padding for b%8==0
    n_tiles = max(2, pl.cdiv(batch, tile_b))             # at least 2 tiles -> both v7x TensorCores
    return _round_up(pl.cdiv(batch, n_tiles), 8)         # balanced; <= 7+ padded rows per tile


# --------------------------------------------------------------------------------------
# Forward pass: single fused pallas_call, gridded over batch tiles.
# --------------------------------------------------------------------------------------
@functools.partial(jax.jit, static_argnames=("output_dim", "leaky_slope", "tile_b"))
def decoder_forward(x, weights, biases, *, output_dim, leaky_slope=0.2, tile_b=1024):
    batch, din = x.shape
    num_layers = len(weights)
    dout_p = weights[-1].shape[1]

    tb = _choose_batch_tile(batch, tile_b)
    batch_p = _round_up(batch, tb)

    # Only pad the batch dim when the tiling actually needs it (no always-on host copy).
    if batch_p != batch:
        x_in = jnp.zeros((batch_p, din), x.dtype).at[:batch, :].set(x)
    else:
        x_in = x

    in_specs = [pl.BlockSpec((tb, din), lambda i: (i, 0))]   # din == full array dim -> legal < 128
    operands = [x_in]
    for w, b in zip(weights, biases):
        # Constant index_map -> weights/biases stay resident in VMEM across all batch tiles.
        in_specs.append(pl.BlockSpec(w.shape, lambda i: (0, 0)))
        in_specs.append(pl.BlockSpec(b.shape, lambda i: (0, 0)))
        operands.extend([w, b])

    kernel = functools.partial(_fused_decoder_kernel,
                               num_layers=num_layers, leaky_slope=leaky_slope)

    out_p = pl.pallas_call(
        kernel,
        out_shape=jax.ShapeDtypeStruct((batch_p, dout_p), jnp.float32),
        grid=(batch_p // tb,),
        in_specs=in_specs,
        out_specs=pl.BlockSpec((tb, dout_p), lambda i: (i, 0)),
        compiler_params=pltpu.CompilerParams(
            dimension_semantics=("parallel",),      # shard batch tiles across TCs (v7x megacore)
            vmem_limit_bytes=32 * 1024 * 1024,      # comfortably within v7x's 64 MiB VMEM
        ),
    )(*operands)

    # Crop only when actually necessary; otherwise return the kernel output untouched (no extra
    # HBM read+write pass on the hot path).
    if batch_p != batch or dout_p != output_dim:
        out_p = out_p[:batch, :output_dim]
    return out_p


# --------------------------------------------------------------------------------------
# Pure-JAX reference with identical dtype semantics (bf16 matmul, f32 accumulate).
# --------------------------------------------------------------------------------------
def decoder_reference(x, weights, biases, *, output_dim, leaky_slope=0.2):
    num_layers = len(weights)
    h = x.astype(jnp.float32)
    for li, (w, b) in enumerate(zip(weights, biases)):
        y = jnp.dot(h.astype(w.dtype), w, preferred_element_type=jnp.float32) + b
        if li < num_layers - 1:
            y = jnp.where(y >= 0.0, y, leaky_slope * y)
        h = y
    return h[:, :output_dim]


if __name__ == "__main__":
    # Decoder(latent_dim=16, hidden_dim=[32, 64], output_dim=128) at batch=8.
    latent_dim = 16
    hidden_dim = [32, 64]
    output_dim = 128
    batch = 8

    key = jax.random.PRNGKey(0)
    k_x, k_p, k_x2 = jax.random.split(key, 3)
    x = jax.random.normal(k_x, (batch, latent_dim), jnp.float32)
    weights, biases = build_decoder_params(k_p, latent_dim, hidden_dim, output_dim)

    out = decoder_forward(x, weights, biases, output_dim=output_dim)
    out = jax.block_until_ready(out)

    ref = decoder_reference(x, weights, biases, output_dim=output_dim)
    assert out.shape == (batch, output_dim), out.shape
    max_err = float(jnp.max(jnp.abs(out - ref)))
    assert jnp.allclose(out, ref, atol=1e-2, rtol=1e-2), max_err

    # Secondary check: exercises the multi-tile / ragged-batch / crop path (batch >= 16 -> >=2 tiles).
    batch2 = 40
    x2 = jax.random.normal(k_x2, (batch2, latent_dim), jnp.float32)
    out2 = jax.block_until_ready(decoder_forward(x2, weights, biases, output_dim=output_dim))
    ref2 = decoder_reference(x2, weights, biases, output_dim=output_dim)
    assert out2.shape == (batch2, output_dim), out2.shape
    max_err2 = float(jnp.max(jnp.abs(out2 - ref2)))
    assert jnp.allclose(out2, ref2, atol=1e-2, rtol=1e-2), max_err2

    print("KERNEL_OK")
</pallas_src>

<mosaic_0001>
module attributes {stable_mosaic.version = 11 : i64} {
  func.func @_fused_decoder_kernel(%arg0: i32, %arg1: memref<8x16xf32, #tpu.memory_space<vmem>>, %arg2: memref<16x128xbf16, #tpu.memory_space<vmem>>, %arg3: memref<1x128xf32, #tpu.memory_space<vmem>>, %arg4: memref<128x128xbf16, #tpu.memory_space<vmem>>, %arg5: memref<1x128xf32, #tpu.memory_space<vmem>>, %arg6: memref<128x128xbf16, #tpu.memory_space<vmem>>, %arg7: memref<1x128xf32, #tpu.memory_space<vmem>>, %arg8: memref<8x128xf32, #tpu.memory_space<vmem>>) attributes {dimension_semantics = [#tpu.dimension_semantics<parallel>], iteration_bounds = array<i64: 1>, scalar_prefetch = 0 : i64, scratch_operands = 0 : i64, tpu.core_type = #tpu.core_type<tc>, window_params = [{transform_indices = @transform_0, window_bounds = array<i64: 8, 16>}, {pipeline_mode = #tpu.pipeline_mode<synchronous>, transform_indices = @transform_1, window_bounds = array<i64: 16, 128>}, {pipeline_mode = #tpu.pipeline_mode<synchronous>, transform_indices = @transform_2, window_bounds = array<i64: 1, 128>}, {pipeline_mode = #tpu.pipeline_mode<synchronous>, transform_indices = @transform_3, window_bounds = array<i64: 128, 128>}, {pipeline_mode = #tpu.pipeline_mode<synchronous>, transform_indices = @transform_4, window_bounds = array<i64: 1, 128>}, {pipeline_mode = #tpu.pipeline_mode<synchronous>, transform_indices = @transform_5, window_bounds = array<i64: 128, 128>}, {pipeline_mode = #tpu.pipeline_mode<synchronous>, transform_indices = @transform_6, window_bounds = array<i64: 1, 128>}, {transform_indices = @transform_7, window_bounds = array<i64: 8, 128>}]} {
    %c0 = arith.constant 0 : index
    %c0_0 = arith.constant 0 : index
    %0 = vector.load %arg1[%c0, %c0_0] : memref<8x16xf32, #tpu.memory_space<vmem>>, vector<8x16xf32>
    %1 = arith.truncf %0 : vector<8x16xf32> to vector<8x16xbf16>
    %c0_1 = arith.constant 0 : index
    %c0_2 = arith.constant 0 : index
    %2 = vector.load %arg2[%c0_1, %c0_2] : memref<16x128xbf16, #tpu.memory_space<vmem>>, vector<16x128xbf16>
    %cst = arith.constant dense<0.000000e+00> : vector<8x128xf32>
    %3 = tpu.matmul %1, %2, %cst {dimension_numbers = #tpu.dot_dimension_numbers<[1], [0], [0], [1], [0, 0, 1, 1], [], []>} : vector<8x16xbf16>, vector<16x128xbf16>, vector<8x128xf32> -> vector<8x128xf32>
    %c0_3 = arith.constant 0 : index
    %c0_4 = arith.constant 0 : index
    %4 = vector.load %arg3[%c0_3, %c0_4] : memref<1x128xf32, #tpu.memory_space<vmem>>, vector<1x128xf32>
    %5 = vector.broadcast %4 : vector<1x128xf32> to vector<8x128xf32>
    %6 = arith.addf %3, %5 : vector<8x128xf32>
    %cst_5 = arith.constant 0.000000e+00 : f32
    %7 = vector.broadcast %cst_5 : f32 to vector<8x128xf32>
    %8 = arith.cmpf oge, %6, %7 : vector<8x128xf32>
    %cst_6 = arith.constant 2.000000e-01 : f32
    %9 = vector.broadcast %cst_6 : f32 to vector<8x128xf32>
    %10 = arith.mulf %9, %6 : vector<8x128xf32>
    %11 = arith.select %8, %6, %10 : vector<8x128xi1>, vector<8x128xf32>
    %12 = arith.truncf %11 : vector<8x128xf32> to vector<8x128xbf16>
    %c0_7 = arith.constant 0 : index
    %c0_8 = arith.constant 0 : index
    %13 = vector.load %arg4[%c0_7, %c0_8] : memref<128x128xbf16, #tpu.memory_space<vmem>>, vector<128x128xbf16>
    %cst_9 = arith.constant dense<0.000000e+00> : vector<8x128xf32>
    %14 = tpu.matmul %12, %13, %cst_9 {dimension_numbers = #tpu.dot_dimension_numbers<[1], [0], [0], [1], [0, 0, 1, 1], [], []>} : vector<8x128xbf16>, vector<128x128xbf16>, vector<8x128xf32> -> vector<8x128xf32>
    %c0_10 = arith.constant 0 : index
    %c0_11 = arith.constant 0 : index
    %15 = vector.load %arg5[%c0_10, %c0_11] : memref<1x128xf32, #tpu.memory_space<vmem>>, vector<1x128xf32>
    %16 = vector.broadcast %15 : vector<1x128xf32> to vector<8x128xf32>
    %17 = arith.addf %14, %16 : vector<8x128xf32>
    %cst_12 = arith.constant 0.000000e+00 : f32
    %18 = vector.broadcast %cst_12 : f32 to vector<8x128xf32>
    %19 = arith.cmpf oge, %17, %18 : vector<8x128xf32>
    %cst_13 = arith.constant 2.000000e-01 : f32
    %20 = vector.broadcast %cst_13 : f32 to vector<8x128xf32>
    %21 = arith.mulf %20, %17 : vector<8x128xf32>
    %22 = arith.select %19, %17, %21 : vector<8x128xi1>, vector<8x128xf32>
    %23 = arith.truncf %22 : vector<8x128xf32> to vector<8x128xbf16>
    %c0_14 = arith.constant 0 : index
    %c0_15 = arith.constant 0 : index
    %24 = vector.load %arg6[%c0_14, %c0_15] : memref<128x128xbf16, #tpu.memory_space<vmem>>, vector<128x128xbf16>
    %cst_16 = arith.constant dense<0.000000e+00> : vector<8x128xf32>
    %25 = tpu.matmul %23, %24, %cst_16 {dimension_numbers = #tpu.dot_dimension_numbers<[1], [0], [0], [1], [0, 0, 1, 1], [], []>} : vector<8x128xbf16>, vector<128x128xbf16>, vector<8x128xf32> -> vector<8x128xf32>
    %c0_17 = arith.constant 0 : index
    %c0_18 = arith.constant 0 : index
    %26 = vector.load %arg7[%c0_17, %c0_18] : memref<1x128xf32, #tpu.memory_space<vmem>>, vector<1x128xf32>
    %27 = vector.broadcast %26 : vector<1x128xf32> to vector<8x128xf32>
    %28 = arith.addf %25, %27 : vector<8x128xf32>
    %c0_19 = arith.constant 0 : index
    %c0_20 = arith.constant 0 : index
    %29 = vector.load %arg8[%c0_19, %c0_20] : memref<8x128xf32, #tpu.memory_space<vmem>>, vector<8x128xf32>
    tpu.vector_store %arg8[%c0_19, %c0_20], %28 {strides = array<i32>} : memref<8x128xf32, #tpu.memory_space<vmem>>, vector<8x128xf32>,
    return
  }
  func.func @transform_0(%arg0: i32) -> (i32, i32) {
    %c0_i32 = arith.constant 0 : i32
    %c0_i32_0 = arith.constant 0 : i32
    return %arg0, %c0_i32 : i32, i32
  }
  func.func @transform_1(%arg0: i32) -> (i32, i32) {
    %c0_i32 = arith.constant 0 : i32
    %c0_i32_0 = arith.constant 0 : i32
    %c0_i32_1 = arith.constant 0 : i32
    return %c0_i32, %c0_i32_0 : i32, i32
  }
  func.func @transform_2(%arg0: i32) -> (i32, i32) {
    %c0_i32 = arith.constant 0 : i32
    %c0_i32_0 = arith.constant 0 : i32
    %c0_i32_1 = arith.constant 0 : i32
    return %c0_i32, %c0_i32_0 : i32, i32
  }
  func.func @transform_3(%arg0: i32) -> (i32, i32) {
    %c0_i32 = arith.constant 0 : i32
    %c0_i32_0 = arith.constant 0 : i32
    %c0_i32_1 = arith.constant 0 : i32
    return %c0_i32, %c0_i32_0 : i32, i32
  }
  func.func @transform_4(%arg0: i32) -> (i32, i32) {
    %c0_i32 = arith.constant 0 : i32
    %c0_i32_0 = arith.constant 0 : i32
    %c0_i32_1 = arith.constant 0 : i32
    return %c0_i32, %c0_i32_0 : i32, i32
  }
  func.func @transform_5(%arg0: i32) -> (i32, i32) {
    %c0_i32 = arith.constant 0 : i32
    %c0_i32_0 = arith.constant 0 : i32
    %c0_i32_1 = arith.constant 0 : i32
    return %c0_i32, %c0_i32_0 : i32, i32
  }
  func.func @transform_6(%arg0: i32) -> (i32, i32) {
    %c0_i32 = arith.constant 0 : i32
    %c0_i32_0 = arith.constant 0 : i32
    %c0_i32_1 = arith.constant 0 : i32
    return %c0_i32, %c0_i32_0 : i32, i32
  }
  func.func @transform_7(%arg0: i32) -> (i32, i32) {
    %c0_i32 = arith.constant 0 : i32
    %c0_i32_0 = arith.constant 0 : i32
    return %arg0, %c0_i32 : i32, i32
  }
}

</mosaic_0001>

<bundles_post_ra>
// kernel: decoder_forward.1
= control target key start
LH: loop header
LB: loop body
LE: loop exit
PB: predicated region body
PF: predicated region fallthrough
CT: control target
= control target key end

     0   :  { %12 = vsyncpa [#allocation3], 0  ;;  %s768_s0 = inlined_call_operand.hbm [shape: f32[8,16], index: 0, kind: input, shape index: {}]   ;;  %s769_s1 = inlined_call_operand.hbm [shape: bf16[16,128], index: 1, kind: input, shape index: {}]   ;;  %s770_s2 = inlined_call_operand.vmem [shape: f32[1,128], index: 2, kind: input, shape index: {}]   ;;  %s771_s3 = inlined_call_operand.hbm [shape: bf16[128,128], index: 3, kind: input, shape index: {}]   ;;  %s772_s4 = inlined_call_operand.vmem [shape: f32[1,128], index: 4, kind: input, shape index: {}]   ;;  %s773_s5 = inlined_call_operand.hbm [shape: bf16[128,128], index: 5, kind: input, shape index: {}]   ;;  %s774_s6 = inlined_call_operand.vmem [shape: f32[1,128], index: 6, kind: input, shape index: {}]   ;;  %s775_s7 = inlined_call_operand.hbm [shape: f32[8,128], index: 7, kind: output, shape index: {}]  }
   0x1   :  { %13 = vsyncpa [#allocation6], 0 }
   0x2   :  { %14 = vsyncpa [#allocation9], 0 }
   0x3   :  { %15 = vsyncpa [#allocation4], 0  ;;  %s621_s24 = smov [#allocation5]   ;;  %s503_s28 = scalar_lea.hbm %s769_s1, 128 }
   0x4   :  { %s31_s25 = sshll.u32 %s621_s24, 4  ;;  %p504_p0 = scmp.ne.s32.totalorder %s769_s1, %s503_s28  ;;  %s32_s25 = int_to_ptr.vmem [resolvable:$true] %s31_s25 }
   0x5   :  { %p507_p1 = scmp.lt.u32.totalorder %s503_s28, %s769_s1 }
   0x7   :  { %p509_p2 = pnand %p507_p1, %p504_p0 }
   0x9   :  { %512 = shalt.err (!%p509_p2)
}
   0xa   :  { %s513_s10 = scalar_lea.vmem %s32_s25, 128  ;;  %p518_p4 = scmp.lt.s32.totalorder %s32_s25, %s32_s25 }
   0xb   :  { %p514_p3 = scmp.ne.s32.totalorder %s32_s25, %s513_s10  ;;  %p519_p5 = scmp.lt.s32.totalorder %s513_s10, %s513_s10 }
   0xd   :  { %p520_p6 = por %p519_p5, %p518_p4 }
   0xf   :  { %p521_p7 = pnand %p520_p6, %p514_p3 }
  0x11   :  { %524 = shalt.err (!%p521_p7)
}
  0x12   :  { %s622_s11 = smov 64   ;;  %s623_s12 = smov 4  }
  0x13   :  { %37 = dma.hbm_to_vmem [thread:$0]  %s769_s1, 128, %s32_s25, [#allocation6], %s622_s11, %s622_s11, %s623_s12  }
  0x14   :  { %s624_s15 = smov [#allocation2]   ;;  %s625_s17 = smov [#allocation7]  }
  0x15   :  { %s22_s16 = sshll.u32 %s624_s15, 4  ;;  %s45_s18 = sshll.u32 %s625_s17, 4  ;;  %s23_s16 = int_to_ptr.vmem [resolvable:$true] %s22_s16  ;;  %s46_s18 = int_to_ptr.vmem [resolvable:$true] %s45_s18 }
  0x16   :  { %s525_s21 = scalar_lea.hbm %s768_s0, 128 }
  0x17   :  { %p526_p8 = scmp.ne.s32.totalorder %s768_s0, %s525_s21  ;;  %p529_p9 = scmp.lt.u32.totalorder %s525_s21, %s768_s0 }
  0x19   :  { %p531_p10 = pnand %p529_p9, %p526_p8 }
  0x1b   :  { %534 = shalt.err (!%p531_p10)
}
  0x1c   :  { %s535_s1 = scalar_lea.vmem %s23_s16, 128  ;;  %p540_p12 = scmp.lt.s32.totalorder %s23_s16, %s23_s16 }
  0x1d   :  { %p536_p11 = scmp.ne.s32.totalorder %s23_s16, %s535_s1  ;;  %p541_p13 = scmp.lt.s32.totalorder %s535_s1, %s535_s1 }
  0x1f   :  { %p542_p0 = por %p541_p13, %p540_p12 }
  0x21   :  { %p543_p1 = pnand %p542_p0, %p536_p11 }
  0x23   :  { %546 = shalt.err (!%p543_p1)
}
  0x24   :  { %25 = dma.hbm_to_vmem [thread:$0]  %s768_s0, 128, %s23_s16, [#allocation3]  }
  0x25   :  { %s547_s30 = scalar_lea.hbm %s771_s3, 1024 }
  0x26   :  { %p548_p2 = scmp.ne.s32.totalorder %s771_s3, %s547_s30  ;;  %p551_p3 = scmp.lt.u32.totalorder %s547_s30, %s771_s3 }
  0x28   :  { %p553_p4 = pnand %p551_p3, %p548_p2 }
  0x2a   :  { %556 = shalt.err (!%p553_p4)
}
  0x2b   :  { %s557_s14 = scalar_lea.vmem %s46_s18, 1024  ;;  %p562_p6 = scmp.lt.s32.totalorder %s46_s18, %s46_s18 }
  0x2c   :  { %p558_p5 = scmp.ne.s32.totalorder %s46_s18, %s557_s14  ;;  %p563_p7 = scmp.lt.s32.totalorder %s557_s14, %s557_s14 }
  0x2e   :  { %p564_p8 = por %p563_p7, %p562_p6 }
  0x30   :  { %p565_p9 = pnand %p564_p8, %p558_p5 }
  0x32   :  { %568 = shalt.err (!%p565_p9)
}
  0x33   :  { %51 = dma.hbm_to_vmem [thread:$0]  %s771_s3, 1024, %s46_s18, [#allocation6], %s622_s11, %s622_s11, %s623_s12  }
  0x34   :  { %s626_s16 = smov [#allocation8]   ;;  %s569_s21 = scalar_lea.hbm %s773_s5, 1024 }
  0x35   :  { %s59_s17 = sshll.u32 %s626_s16, 4  ;;  %p570_p10 = scmp.ne.s32.totalorder %s773_s5, %s569_s21  ;;  %s60_s17 = int_to_ptr.vmem [resolvable:$true] %s59_s17 }
  0x36   :  { %p573_p11 = scmp.lt.u32.totalorder %s569_s21, %s773_s5 }
  0x38   :  { %p575_p12 = pnand %p573_p11, %p570_p10 }
  0x3a   :  { %578 = shalt.err (!%p575_p12)
}
  0x3b   :  { %s579_s1 = scalar_lea.vmem %s60_s17, 1024  ;;  %p584_p0 = scmp.lt.s32.totalorder %s60_s17, %s60_s17 }
  0x3c   :  { %p580_p13 = scmp.ne.s32.totalorder %s60_s17, %s579_s1  ;;  %p585_p1 = scmp.lt.s32.totalorder %s579_s1, %s579_s1 }
  0x3e   :  { %p586_p2 = por %p585_p1, %p584_p0 }
  0x40   :  { %p587_p3 = pnand %p586_p2, %p580_p13 }
  0x42   :  { %590 = shalt.err (!%p587_p3)
}
  0x43   :  { %65 = dma.hbm_to_vmem [thread:$0]  %s773_s5, 1024, %s60_s17, [#allocation9], %s622_s11, %s622_s11, %s623_s12  }
  0x44   :  { %613 = dma.done.wait [#allocation3], 128  }
  0x45   :  { %614 = vsyncadd [#allocation3], 4294967168 }
  0x46   :  { %615 = dma.done.wait [#allocation6], 1152  }
  0x47   :  { %616 = vsyncadd [#allocation6], 4294966144 }
  0x48   :  { %617 = dma.done.wait [#allocation9], 1024  }
  0x49   :  { %618 = vsyncadd [#allocation9], 4294966272  ;;  %v627_v0 = vmov 0.0   ;;  %vm628_vm0 = vmmov 0   ;;  %v486_v1 = vld [vmem:[#allocation5] sm:$0xff]   ;;  %v81_v2 = vld [vmem:[#allocation2] sm:$0xff] }
  0x4a   :  { %431 = vmatprep.subr.bf16.mxu0 %v627_v0  ;;  %433 = vmatprep.mubr.msk.bf16.mxu0 %vm628_vm0, %v627_v0  ;;  %v82_v3 = vpack.c.bf16 %v81_v2, %v81_v2  ;;  %vm98_vm1 = vcmask 130048   ;;  %v487_v4 = vld [vmem:[#allocation7] sm:$0xff]   ;;  %v488_v5 = vld [vmem:[#allocation7 + $0x8] sm:$0xff]   ;;  %v489_v6 = vld [vmem:[#allocation7 + $0x10] sm:$0xff]   ;;  %s629_s28 = smov [#allocation10]  }
  0x4b   :  { %437 = vmatprep.subr.bf16.mxu1 %v627_v0  ;;  %453 = vmatprep.mubr.msk.bf16.mxu1 %vm628_vm0, %v627_v0  ;;  %v490_v7 = vld [vmem:[#allocation7 + $0x18] sm:$0xff]   ;;  %v491_v8 = vld [vmem:[#allocation7 + $0x20] sm:$0xff]   ;;  %v492_v9 = vld [vmem:[#allocation7 + $0x28] sm:$0xff]   ;;  %s379_s29 = sshll.u32 %s629_s28, 4  ;;  %s380_s29 = int_to_ptr.vmem [resolvable:$true] %s379_s29 }
  0x4c   :  { %432 = vmatpush3.bf16.msra.mxu0 %v486_v1  ;;  %438 = vmatpush3.bf16.msra.mxu1 %v487_v4  ;;  %v493_v10 = vld [vmem:[#allocation7 + $0x30] sm:$0xff]   ;;  %v494_v11 = vld [vmem:[#allocation7 + $0x38] sm:$0xff]   ;;  %v495_v12 = vld [vmem:[#allocation8] sm:$0xff]   ;;  %p596_p5 = scmp.lt.s32.totalorder %s380_s29, %s380_s29 }
  0x4d   :  { %457 = vmatprep.subr.bf16.mxu0 %v627_v0  ;;  %439 = vmatprep.subr.bf16.mxu1 %v627_v0  ;;  %v496_v13 = vld [vmem:[#allocation8 + $0x8] sm:$0xff]   ;;  %v497_v14 = vld [vmem:[#allocation8 + $0x10] sm:$0xff]   ;;  %v498_v15 = vld [vmem:[#allocation8 + $0x18] sm:$0xff]  }
  0x4e   :  { %v499_v16 = vld [vmem:[#allocation8 + $0x20] sm:$0xff]   ;;  %v500_v17 = vld [vmem:[#allocation8 + $0x28] sm:$0xff]   ;;  %v390_v18 = vld [vmem:[%s770_s2] ss:$0 sm:$0xff] }
  0x4f   :  { %434 = vmatmul.mubr.msk.bf16.vlgmr.msra.gmra.mrb[0].mxu0 %vm98_vm1, %v82_v3  ;;  %v501_v27 = vld [vmem:[#allocation8 + $0x30] sm:$0xff]   ;;  %v502_v28 = vld [vmem:[#allocation8 + $0x38] sm:$0xff]  }
  0x50   :  { %473 = vmatprep.mubr.msk.bf16.mxu0 %vm628_vm0, %v627_v0  ;;  %440 = vmatpush3.bf16.msra.mxu1 %v488_v5  ;;  %v393_v29 = vld [vmem:[%s772_s4] ss:$0 sm:$0xff]  ;;  %s591_s4 = scalar_lea.vmem %s380_s29, 128 }
  0x51   :  { %441 = vmatprep.subr.bf16.mxu1 %v627_v0  ;;  %458 = vmatpush3.bf16.msra.mxu0 %v495_v12  ;;  %v402_v38 = vld [vmem:[%s774_s6] ss:$0 sm:$0xff]  ;;  %p592_p4 = scmp.ne.s32.totalorder %s380_s29, %s591_s4  ;;  %p597_p6 = scmp.lt.s32.totalorder %s591_s4, %s591_s4 }
  0x52   :  { %459 = vmatprep.subr.bf16.mxu0 %v627_v0 }
  0x53   :  { %p598_p7 = por %p597_p6, %p596_p5 }
  0x54   :  { %442 = vmatpush3.bf16.msra.mxu1 %v489_v6 }
  0x55   :  { %443 = vmatprep.subr.bf16.mxu1 %v627_v0  ;;  %460 = vmatpush3.bf16.msra.mxu0 %v496_v13  ;;  %p599_p8 = pnand %p598_p7, %p592_p4 }
  0x56   :  { %461 = vmatprep.subr.bf16.mxu0 %v627_v0 }
  0x58   :  { %444 = vmatpush3.bf16.msra.mxu1 %v490_v7 }
  0x59   :  { %445 = vmatprep.subr.bf16.mxu1 %v627_v0  ;;  %462 = vmatpush3.bf16.msra.mxu0 %v497_v14 }
  0x5a   :  { %463 = vmatprep.subr.bf16.mxu0 %v627_v0 }
  0x5c   :  { %446 = vmatpush3.bf16.msra.mxu1 %v491_v8 }
  0x5d   :  { %447 = vmatprep.subr.bf16.mxu1 %v627_v0  ;;  %464 = vmatpush3.bf16.msra.mxu0 %v498_v15 }
  0x5e   :  { %465 = vmatprep.subr.bf16.mxu0 %v627_v0 }
  0x60   :  { %448 = vmatpush3.bf16.msra.mxu1 %v492_v9 }
  0x61   :  { %449 = vmatprep.subr.bf16.mxu1 %v627_v0  ;;  %466 = vmatpush3.bf16.msra.mxu0 %v499_v16 }
  0x62   :  { %467 = vmatprep.subr.bf16.mxu0 %v627_v0 }
  0x64   :  { %450 = vmatpush3.bf16.msra.mxu1 %v493_v10 }
  0x65   :  { %451 = vmatprep.subr.bf16.mxu1 %v627_v0  ;;  %468 = vmatpush3.bf16.msra.mxu0 %v500_v17 }
  0x66   :  { %469 = vmatprep.subr.bf16.mxu0 %v627_v0 }
  0x68   :  { %452 = vmatpush3.bf16.msra.mxu1 %v494_v11 }
  0x69   :  { %470 = vmatpush3.bf16.msra.mxu0 %v501_v27 }
  0x6a   :  { %471 = vmatprep.subr.bf16.mxu0 %v627_v0 }
  0x6d   :  { %472 = vmatpush3.bf16.msra.mxu0 %v502_v28 }
 0x122   :  { %v136_v19 = vpop.f32.mrb[0].mxu0 }
 0x123   :  { %v137_v20 = vadd.f32 %v390_v18, %v136_v19  ;;  %v435_v21 = vpop.f32.mrb[1].mxu0 }
 0x124   :  { %v139_v22 = vpop.f32.mrb[2].mxu0 }
 0x125   :  { %vm142_vm2 = vcmp.ge.f32.partialorder %v137_v20, 0.0  ;;  %v143_v23 = vmul.f32 0.2, %v137_v20  ;;  %v436_v24 = vpop.f32.mrb[3].mxu0 }
 0x127   :  { %v144_v25 = vsel %vm142_vm2, %v137_v20, %v143_v23 }
 0x128   :  { %v145_v26 = vpack.c.bf16 %v144_v25, %v144_v25 }
 0x12a   :  { %454 = vmatmul.mubr.bf16.vlgmr.msra.gmra.mrb[0].mxu1 %v145_v26 }
 0x1fd   :  { %v251_v30 = vpop.f32.mrb[0].mxu1 }
 0x1fe   :  { %v252_v31 = vadd.f32 %v393_v29, %v251_v30  ;;  %v455_v32 = vpop.f32.mrb[1].mxu1 }
 0x1ff   :  { %v254_v33 = vpop.f32.mrb[2].mxu1 }
 0x200   :  { %vm257_vm3 = vcmp.ge.f32.partialorder %v252_v31, 0.0  ;;  %v258_v34 = vmul.f32 0.2, %v252_v31  ;;  %v456_v35 = vpop.f32.mrb[3].mxu1 }
 0x202   :  { %v259_v36 = vsel %vm257_vm3, %v252_v31, %v258_v34 }
 0x203   :  { %v260_v37 = vpack.c.bf16 %v259_v36, %v259_v36 }
 0x205   :  { %474 = vmatmul.mubr.bf16.vlgmr.msra.gmra.mrb[4].mxu0 %v260_v37 }
 0x2d8   :  { %v366_v39 = vpop.f32.mrb[4].mxu0 }
 0x2d9   :  { %v367_v40 = vadd.f32 %v402_v38, %v366_v39  ;;  %v475_v41 = vpop.f32.mrb[5].mxu0 }
 0x2da   :  { %v369_v42 = vpop.f32.mrb[6].mxu0 }
 0x2db   :  { %372 = vst [vmem:[#allocation10] sm:$0xff] %v367_v40  ;;  %v476_v43 = vpop.f32.mrb[7].mxu0 }
 0x2dc   :  { %602 = shalt.err (!%p599_p8)
}
 0x2dd   :  { %s603_s6 = scalar_lea.hbm %s775_s7, 128 }
 0x2de   :  { %p604_p9 = scmp.ne.s32.totalorder %s775_s7, %s603_s6  ;;  %p607_p10 = scmp.lt.u32.totalorder %s603_s6, %s775_s7 }
 0x2e0   :  { %p609_p11 = pnand %p607_p10, %p604_p9 }
 0x2e2   :  { %612 = shalt.err (!%p609_p11)
}
 0x2e3   :  { %382 = dma.vmem_to_hbm [thread:$0]  %s380_s29, 128, %s775_s7, [#allocation4]  }
 0x2e4   :  { %619 = dma.done.wait [#allocation4], 128  }
 0x2e5   :  { %620 = vsyncadd [#allocation4], 4294967168 }
 0x2e6   :  { %386 = vsyncpa [#allocation3], 1 }
 0x2e7   :  { %387 = vsyncpa [#allocation6], 1 }
 0x2e8   :  { %388 = vsyncpa [#allocation9], 1 }
 0x2e9   :  { %389 = vsyncpa [#allocation4], 1 }

</bundles_post_ra>
